<compile_context>
chip_gen: v5e
topology: v5e:2x2
jax: 0.10.0
libtpu: 0.0.40
codegen_flags: <defaults>
</compile_context>

<pallas_src>
import numpy as np
import jax
import jax.numpy as jnp
from jax.experimental import pallas as pl
from jax.experimental.pallas import tpu as pltpu


# ----------------------------------------------------------------------------- utils
def _centered_dft_matrix(n):
    """Matrix M s.t. M @ x == ifftshift(fft(fftshift(x), norm='ortho'))."""
    k = np.arange(n)
    F = np.exp(-2j * np.pi * np.outer(k, k) / n) / np.sqrt(n)
    P_f = np.eye(n)[np.fft.fftshift(k)]    # applies fftshift
    P_i = np.eye(n)[np.fft.ifftshift(k)]   # applies ifftshift
    return (P_i @ F @ P_f).astype(np.complex64)


def _ri(x):
    """complex array -> float32 array with a leading (real, imag) dim of size 2."""
    return jnp.stack([jnp.real(x), jnp.imag(x)], axis=0).astype(jnp.float32)


def prepare_maps(maps):
    """Pre-split maps to the (2,B,C,H,W) f32 layout once; pass via maps_ri=."""
    return _ri(jnp.asarray(maps))


def _default_use_bf16():
    """bf16 MXU operands (with f32 accumulation) are the fast path on v6e / v7x."""
    try:
        kind = jax.devices()[0].device_kind.lower()
        return ("v6" in kind) or ("v7" in kind)
    except Exception:
        return False


def _vmem_capacity():
    try:
        info = pltpu.get_tpu_info()
        cap = getattr(info, "vmem_capacity_bytes", None)
        if cap:
            return int(cap)
    except Exception:
        pass
    return 64 << 20   # conservative (v7x-sized) fallback


def _choose_coil_tile(B, C, H, W, use_bf16, budget_bytes):
    """Largest coil tile whose per-step VMEM estimate fits the budget and keeps
    at least two grid steps (both v7x TensorCores busy)."""
    mm_bytes = 2 if use_bf16 else 4

    def est(ct):
        slab = ct * H * W
        # double-buffered DMA blocks (r/i, f32): image, maps, A, Bm, mask, out
        blocks = 2 * 2 * 4 * (H * W + slab + H * H + W * W + H * W + slab)
        # live in-kernel f32 temporaries: coil r/i, T r/i, Gauss sums
        live_f32 = 4 * 2 * 3 * slab
        # bf16 (or f32) casts of the stage-1 matmul operands
        live_mm = mm_bytes * 2 * 2 * slab
        return blocks + live_f32 + live_mm

    best = 1
    for ct in range(1, C + 1):
        if C % ct:
            continue
        if est(ct) > budget_bytes:
            continue
        if ct > 1 and B * (C // ct) < 2:   # keep >= 2 grid steps for 2-TC chips
            continue
        best = ct
    return best


# ----------------------------------------------------------------------------- kernel
def _make_kernel(ct, h, w, use_bf16, has_mask):
    mm = jnp.bfloat16 if use_bf16 else jnp.float32
    f32 = jnp.float32

    def compute(img_ref, map_ref, a_ref, b_ref, mask_ref, out_ref):
        # coil images: coil = image * maps, coils stacked along the SUBLANE axis.
        img_r = img_ref[0, 0]                                # (H, W)
        img_i = img_ref[1, 0]
        map_r = map_ref[0, 0]                                # (ct, H, W)
        map_i = map_ref[1, 0]
        coil_r = (img_r[None] * map_r - img_i[None] * map_i).reshape(ct * h, w)
        coil_i = (img_r[None] * map_i + img_i[None] * map_r).reshape(ct * h, w)

        # Stage 1: W-axis centered DFT (mask folded in for 'vertical') as ONE fat-M
        # Gauss 3-multiply complex matmul covering all ct coils (single weight push).
        b_r = b_ref[0, 0]                                    # (W, W)
        b_i = b_ref[1, 0]
        p1 = jnp.dot(coil_r.astype(mm), b_r.astype(mm), preferred_element_type=f32)
        p2 = jnp.dot(coil_i.astype(mm), b_i.astype(mm), preferred_element_type=f32)
        p3 = jnp.dot((coil_r + coil_i).astype(mm), (b_r + b_i).astype(mm),
                     preferred_element_type=f32)
        t_r = p1 - p2                                        # (ct*H, W)
        t_i = p3 - p1 - p2

        # Stage 2: H-axis centered DFT (mask folded in for 'horizontal'), per coil.
        # Gauss pre-sums computed in f32, cast once (v5e VPU has no bf16 ALU).
        a_r = a_ref[0, 0].astype(mm)                         # (H, H)
        a_i = a_ref[1, 0].astype(mm)
        a_s = (a_ref[0, 0] + a_ref[1, 0]).astype(mm)
        if has_mask:
            m_r = mask_ref[0, 0]                             # (H, W)
            m_i = mask_ref[1, 0]
        for c in range(ct):
            tc_r = t_r[c * h:(c + 1) * h, :]
            tc_i = t_i[c * h:(c + 1) * h, :]
            q1 = jnp.dot(a_r, tc_r.astype(mm), preferred_element_type=f32)
            q2 = jnp.dot(a_i, tc_i.astype(mm), preferred_element_type=f32)
            q3 = jnp.dot(a_s, (tc_r + tc_i).astype(mm), preferred_element_type=f32)
            y_r = q1 - q2
            y_i = q3 - q1 - q2
            if has_mask:    # 3-D (B,H,W) sampling mask applied in-kernel before store
                y_r, y_i = y_r * m_r - y_i * m_i, y_r * m_i + y_i * m_r
            out_ref[0, 0, c, :, :] = y_r
            out_ref[1, 0, c, :, :] = y_i

    if has_mask:
        def kernel(img_ref, map_ref, a_ref, b_ref, mask_ref, out_ref):
            compute(img_ref, map_ref, a_ref, b_ref, mask_ref, out_ref)
    else:
        def kernel(img_ref, map_ref, a_ref, b_ref, out_ref):
            compute(img_ref, map_ref, a_ref, b_ref, None, out_ref)
    return kernel


# ----------------------------------------------------------------------------- wrapper
def multicoil_forward_mri(image, maps, mask, orientation="vertical",
                          coil_tile=None, use_bf16=None, maps_ri=None):
    """image [B,H,W] c64, maps [B,C,H,W] c64, mask [B,W] / [B,H] / [B,H,W] c64.
    Returns masked multicoil k-space [B,C,H,W] complex64."""
    image = jnp.asarray(image)
    maps = jnp.asarray(maps)
    mask = jnp.asarray(mask)
    B, C, H, W = maps.shape
    c64 = jnp.complex64

    if use_bf16 is None:
        use_bf16 = _default_use_bf16()

    Mh = jnp.asarray(_centered_dft_matrix(H))        # (H, H): DFT along H (left mult)
    MwT = jnp.asarray(_centered_dft_matrix(W)).T     # (W, W): DFT along W (right mult)

    mask3d = None
    if orientation == "vertical":
        A = Mh[None]                                                 # (1, H, H) batch-invariant
        Bm = MwT[None, :, :] * mask.astype(c64)[:, None, :]          # (B, W, W) column-masked
    elif orientation == "horizontal":
        A = mask.astype(c64)[:, :, None] * Mh[None, :, :]            # (B, H, H) row-masked
        Bm = MwT[None]                                               # (1, W, W) batch-invariant
    elif mask.ndim == 3:
        A = Mh[None]
        Bm = MwT[None]
        mask3d = mask.astype(c64)                                    # applied in-kernel
    else:
        raise NotImplementedError("mask orientation not supported")

    capacity = _vmem_capacity()
    budget = int(capacity * 0.40)
    ct = coil_tile if coil_tile is not None else _choose_coil_tile(B, C, H, W, use_bf16, budget)
    assert C % ct == 0, "coil_tile must divide C"

    img_p = _ri(image)                                   # (2, B, H, W)
    map_p = _ri(maps) if maps_ri is None else maps_ri    # (2, B, C, H, W)
    a_p = _ri(A)                                         # (2, 1 or B, H, H)
    b_p = _ri(Bm)                                        # (2, 1 or B, W, W)

    a_idx = (lambda b, k: (0, b, 0, 0)) if a_p.shape[1] == B else (lambda b, k: (0, 0, 0, 0))
    b_idx = (lambda b, k: (0, b, 0, 0)) if b_p.shape[1] == B else (lambda b, k: (0, 0, 0, 0))

    in_specs = [
        pl.BlockSpec((2, 1, H, W), lambda b, k: (0, b, 0, 0)),          # image
        pl.BlockSpec((2, 1, ct, H, W), lambda b, k: (0, b, k, 0, 0)),   # maps
        pl.BlockSpec((2, 1, H, H), a_idx),                              # Mh (row-masked if horizontal)
        pl.BlockSpec((2, 1, W, W), b_idx),                              # Mw^T (col-masked if vertical)
    ]
    inputs = [img_p, map_p, a_p, b_p]
    has_mask = mask3d is not None
    if has_mask:
        in_specs.append(pl.BlockSpec((2, 1, H, W), lambda b, k: (0, b, 0, 0)))
        inputs.append(_ri(mask3d))                                      # (2, B, H, W)

    kernel = _make_kernel(ct, H, W, use_bf16, has_mask)

    out_p = pl.pallas_call(
        kernel,
        out_shape=jax.ShapeDtypeStruct((2, B, C, H, W), jnp.float32),
        grid_spec=pltpu.PrefetchScalarGridSpec(
            num_scalar_prefetch=0,
            grid=(B, C // ct),
            in_specs=in_specs,
            out_specs=pl.BlockSpec((2, 1, ct, H, W), lambda b, k: (0, b, k, 0, 0)),
        ),
        compiler_params=pltpu.CompilerParams(
            dimension_semantics=("parallel", "parallel"),
            vmem_limit_bytes=int(capacity * 0.5)),
    )(*inputs)

    # Assemble complex64 output directly in (B, C, H, W) — no transpose pass.
    return jax.lax.complex(out_p[0], out_p[1])


# ----------------------------------------------------------------------------- reference
def _reference(image, maps, mask, orientation="vertical"):
    coils = image[:, None] * maps
    x = jnp.fft.fftshift(coils, axes=(-2, -1))
    x = jnp.fft.fft2(x, axes=(-2, -1), norm="ortho")
    ksp = jnp.fft.ifftshift(x, axes=(-2, -1))
    if orientation == "vertical":
        return ksp * mask[:, None, None, :]
    elif orientation == "horizontal":
        return ksp * mask[:, None, :, None]
    else:
        return ksp * mask[:, None, :, :]


if __name__ == "__main__":
    B, C, H, W = 2, 4, 16, 16
    key = jax.random.PRNGKey(0)
    k1, k2, k3, k4, k5, k6 = jax.random.split(key, 6)

    image = (jax.random.normal(k1, (B, H, W), jnp.float32)
             + 1j * jax.random.normal(k2, (B, H, W), jnp.float32)).astype(jnp.complex64)
    maps = (jax.random.normal(k3, (B, C, H, W), jnp.float32)
            + 1j * jax.random.normal(k4, (B, C, H, W), jnp.float32)).astype(jnp.complex64)
    mask_v = jax.random.bernoulli(k5, 0.5, (B, W)).astype(jnp.complex64)
    mask_h = jax.random.bernoulli(k6, 0.5, (B, H)).astype(jnp.complex64)
    mask_2d = jax.random.bernoulli(k5, 0.5, (B, H, W)).astype(jnp.complex64)

    # f32 accuracy checks on all three mask paths (vertical / horizontal / 3-D mask).
    for orient, m in (("vertical", mask_v), ("horizontal", mask_h), ("2d", mask_2d)):
        out = jax.block_until_ready(
            multicoil_forward_mri(image, maps, m, orientation=orient, use_bf16=False))
        ref = _reference(image, maps, m, orientation=orient)
        assert out.shape == (B, C, H, W) and out.dtype == jnp.complex64
        np.testing.assert_allclose(np.asarray(out), np.asarray(ref), rtol=1e-3, atol=1e-3)

    # bf16-operand fast path (f32 accumulation): norm-level accuracy check.
    out_bf16 = jax.block_until_ready(
        multicoil_forward_mri(image, maps, mask_v, orientation="vertical", use_bf16=True))
    ref_v = np.asarray(_reference(image, maps, mask_v, orientation="vertical"))
    rel = np.linalg.norm(np.asarray(out_bf16) - ref_v) / np.linalg.norm(ref_v)
    assert np.isfinite(rel) and rel < 5e-2, f"bf16 relative error too large: {rel}"

    print("KERNEL_OK")
</pallas_src>

<mosaic_0001>
module attributes {stable_mosaic.version = 11 : i64} {
  func.func @kernel(%arg0: i32, %arg1: i32, %arg2: memref<2x1x16x16xf32, #tpu.memory_space<vmem>>, %arg3: memref<2x1x4x16x16xf32, #tpu.memory_space<vmem>>, %arg4: memref<2x1x16x16xf32, #tpu.memory_space<vmem>>, %arg5: memref<2x1x16x16xf32, #tpu.memory_space<vmem>>, %arg6: memref<2x1x4x16x16xf32, #tpu.memory_space<vmem>>) attributes {dimension_semantics = [#tpu.dimension_semantics<parallel>, #tpu.dimension_semantics<parallel>], iteration_bounds = array<i64: 2, 1>, scalar_prefetch = 0 : i64, scratch_operands = 0 : i64, tpu.core_type = #tpu.core_type<tc>, window_params = [{transform_indices = @transform_0, window_bounds = array<i64: 2, 1, 16, 16>}, {transform_indices = @transform_1, window_bounds = array<i64: 2, 1, 4, 16, 16>}, {pipeline_mode = #tpu.pipeline_mode<synchronous>, transform_indices = @transform_2, window_bounds = array<i64: 2, 1, 16, 16>}, {transform_indices = @transform_3, window_bounds = array<i64: 2, 1, 16, 16>}, {transform_indices = @transform_4, window_bounds = array<i64: 2, 1, 4, 16, 16>}]} {
    %c0 = arith.constant 0 : index
    %c0_0 = arith.constant 0 : index
    %c0_1 = arith.constant 0 : index
    %c0_2 = arith.constant 0 : index
    %0 = vector.load %arg2[%c0, %c0_0, %c0_1, %c0_2] : memref<2x1x16x16xf32, #tpu.memory_space<vmem>>, vector<1x1x16x16xf32>
    %1 = vector.shape_cast %0 : vector<1x1x16x16xf32> to vector<16x16xf32>
    %c1 = arith.constant 1 : index
    %c0_3 = arith.constant 0 : index
    %c0_4 = arith.constant 0 : index
    %c0_5 = arith.constant 0 : index
    %2 = vector.load %arg2[%c1, %c0_3, %c0_4, %c0_5] : memref<2x1x16x16xf32, #tpu.memory_space<vmem>>, vector<1x1x16x16xf32>
    %3 = vector.shape_cast %2 : vector<1x1x16x16xf32> to vector<16x16xf32>
    %c0_6 = arith.constant 0 : index
    %c0_7 = arith.constant 0 : index
    %c0_8 = arith.constant 0 : index
    %c0_9 = arith.constant 0 : index
    %c0_10 = arith.constant 0 : index
    %4 = vector.load %arg3[%c0_6, %c0_7, %c0_8, %c0_9, %c0_10] : memref<2x1x4x16x16xf32, #tpu.memory_space<vmem>>, vector<1x1x4x16x16xf32>
    %5 = vector.shape_cast %4 : vector<1x1x4x16x16xf32> to vector<4x16x16xf32>
    %c1_11 = arith.constant 1 : index
    %c0_12 = arith.constant 0 : index
    %c0_13 = arith.constant 0 : index
    %c0_14 = arith.constant 0 : index
    %c0_15 = arith.constant 0 : index
    %6 = vector.load %arg3[%c1_11, %c0_12, %c0_13, %c0_14, %c0_15] : memref<2x1x4x16x16xf32, #tpu.memory_space<vmem>>, vector<1x1x4x16x16xf32>
    %7 = vector.shape_cast %6 : vector<1x1x4x16x16xf32> to vector<4x16x16xf32>
    %8 = vector.shape_cast %1 : vector<16x16xf32> to vector<1x16x16xf32>
    %9 = vector.broadcast %8 : vector<1x16x16xf32> to vector<4x16x16xf32>
    %10 = arith.mulf %9, %5 : vector<4x16x16xf32>
    %11 = vector.shape_cast %3 : vector<16x16xf32> to vector<1x16x16xf32>
    %12 = vector.broadcast %11 : vector<1x16x16xf32> to vector<4x16x16xf32>
    %13 = arith.mulf %12, %7 : vector<4x16x16xf32>
    %14 = arith.subf %10, %13 : vector<4x16x16xf32>
    %15 = vector.shape_cast %14 : vector<4x16x16xf32> to vector<64x16xf32>
    %16 = vector.shape_cast %1 : vector<16x16xf32> to vector<1x16x16xf32>
    %17 = vector.broadcast %16 : vector<1x16x16xf32> to vector<4x16x16xf32>
    %18 = arith.mulf %17, %7 : vector<4x16x16xf32>
    %19 = vector.shape_cast %3 : vector<16x16xf32> to vector<1x16x16xf32>
    %20 = vector.broadcast %19 : vector<1x16x16xf32> to vector<4x16x16xf32>
    %21 = arith.mulf %20, %5 : vector<4x16x16xf32>
    %22 = arith.addf %18, %21 : vector<4x16x16xf32>
    %23 = vector.shape_cast %22 : vector<4x16x16xf32> to vector<64x16xf32>
    %c0_16 = arith.constant 0 : index
    %c0_17 = arith.constant 0 : index
    %c0_18 = arith.constant 0 : index
    %c0_19 = arith.constant 0 : index
    %24 = vector.load %arg5[%c0_16, %c0_17, %c0_18, %c0_19] : memref<2x1x16x16xf32, #tpu.memory_space<vmem>>, vector<1x1x16x16xf32>
    %25 = vector.shape_cast %24 : vector<1x1x16x16xf32> to vector<16x16xf32>
    %c1_20 = arith.constant 1 : index
    %c0_21 = arith.constant 0 : index
    %c0_22 = arith.constant 0 : index
    %c0_23 = arith.constant 0 : index
    %26 = vector.load %arg5[%c1_20, %c0_21, %c0_22, %c0_23] : memref<2x1x16x16xf32, #tpu.memory_space<vmem>>, vector<1x1x16x16xf32>
    %27 = vector.shape_cast %26 : vector<1x1x16x16xf32> to vector<16x16xf32>
    %cst = arith.constant dense<0.000000e+00> : vector<64x16xf32>
    %28 = tpu.matmul %15, %25, %cst {dimension_numbers = #tpu.dot_dimension_numbers<[1], [0], [0], [1], [0, 0, 1, 1], [], []>} : vector<64x16xf32>, vector<16x16xf32>, vector<64x16xf32> -> vector<64x16xf32>
    %cst_24 = arith.constant dense<0.000000e+00> : vector<64x16xf32>
    %29 = tpu.matmul %23, %27, %cst_24 {dimension_numbers = #tpu.dot_dimension_numbers<[1], [0], [0], [1], [0, 0, 1, 1], [], []>} : vector<64x16xf32>, vector<16x16xf32>, vector<64x16xf32> -> vector<64x16xf32>
    %30 = arith.addf %15, %23 : vector<64x16xf32>
    %31 = arith.addf %25, %27 : vector<16x16xf32>
    %cst_25 = arith.constant dense<0.000000e+00> : vector<64x16xf32>
    %32 = tpu.matmul %30, %31, %cst_25 {dimension_numbers = #tpu.dot_dimension_numbers<[1], [0], [0], [1], [0, 0, 1, 1], [], []>} : vector<64x16xf32>, vector<16x16xf32>, vector<64x16xf32> -> vector<64x16xf32>
    %33 = arith.subf %28, %29 : vector<64x16xf32>
    %34 = arith.subf %32, %28 : vector<64x16xf32>
    %35 = arith.subf %34, %29 : vector<64x16xf32>
    %c0_26 = arith.constant 0 : index
    %c0_27 = arith.constant 0 : index
    %c0_28 = arith.constant 0 : index
    %c0_29 = arith.constant 0 : index
    %36 = vector.load %arg4[%c0_26, %c0_27, %c0_28, %c0_29] : memref<2x1x16x16xf32, #tpu.memory_space<vmem>>, vector<1x1x16x16xf32>
    %37 = vector.shape_cast %36 : vector<1x1x16x16xf32> to vector<16x16xf32>
    %c1_30 = arith.constant 1 : index
    %c0_31 = arith.constant 0 : index
    %c0_32 = arith.constant 0 : index
    %c0_33 = arith.constant 0 : index
    %38 = vector.load %arg4[%c1_30, %c0_31, %c0_32, %c0_33] : memref<2x1x16x16xf32, #tpu.memory_space<vmem>>, vector<1x1x16x16xf32>
    %39 = vector.shape_cast %38 : vector<1x1x16x16xf32> to vector<16x16xf32>
    %c0_34 = arith.constant 0 : index
    %c0_35 = arith.constant 0 : index
    %c0_36 = arith.constant 0 : index
    %c0_37 = arith.constant 0 : index
    %40 = vector.load %arg4[%c0_34, %c0_35, %c0_36, %c0_37] : memref<2x1x16x16xf32, #tpu.memory_space<vmem>>, vector<1x1x16x16xf32>
    %41 = vector.shape_cast %40 : vector<1x1x16x16xf32> to vector<16x16xf32>
    %c1_38 = arith.constant 1 : index
    %c0_39 = arith.constant 0 : index
    %c0_40 = arith.constant 0 : index
    %c0_41 = arith.constant 0 : index
    %42 = vector.load %arg4[%c1_38, %c0_39, %c0_40, %c0_41] : memref<2x1x16x16xf32, #tpu.memory_space<vmem>>, vector<1x1x16x16xf32>
    %43 = vector.shape_cast %42 : vector<1x1x16x16xf32> to vector<16x16xf32>
    %44 = arith.addf %41, %43 : vector<16x16xf32>
    %45 = vector.extract_strided_slice %33 {offsets = [0, 0], sizes = [16, 16], strides = [1, 1]} : vector<64x16xf32> to vector<16x16xf32>
    %46 = vector.extract_strided_slice %35 {offsets = [0, 0], sizes = [16, 16], strides = [1, 1]} : vector<64x16xf32> to vector<16x16xf32>
    %cst_42 = arith.constant dense<0.000000e+00> : vector<16x16xf32>
    %47 = tpu.matmul %37, %45, %cst_42 {dimension_numbers = #tpu.dot_dimension_numbers<[1], [0], [0], [1], [0, 0, 1, 1], [], []>} : vector<16x16xf32>, vector<16x16xf32>, vector<16x16xf32> -> vector<16x16xf32>
    %cst_43 = arith.constant dense<0.000000e+00> : vector<16x16xf32>
    %48 = tpu.matmul %39, %46, %cst_43 {dimension_numbers = #tpu.dot_dimension_numbers<[1], [0], [0], [1], [0, 0, 1, 1], [], []>} : vector<16x16xf32>, vector<16x16xf32>, vector<16x16xf32> -> vector<16x16xf32>
    %49 = arith.addf %45, %46 : vector<16x16xf32>
    %cst_44 = arith.constant dense<0.000000e+00> : vector<16x16xf32>
    %50 = tpu.matmul %44, %49, %cst_44 {dimension_numbers = #tpu.dot_dimension_numbers<[1], [0], [0], [1], [0, 0, 1, 1], [], []>} : vector<16x16xf32>, vector<16x16xf32>, vector<16x16xf32> -> vector<16x16xf32>
    %51 = arith.subf %47, %48 : vector<16x16xf32>
    %52 = arith.subf %50, %47 : vector<16x16xf32>
    %53 = arith.subf %52, %48 : vector<16x16xf32>
    %c0_45 = arith.constant 0 : index
    %c0_46 = arith.constant 0 : index
    %c0_47 = arith.constant 0 : index
    %c0_48 = arith.constant 0 : index
    %c0_49 = arith.constant 0 : index
    %54 = vector.load %arg6[%c0_45, %c0_46, %c0_47, %c0_48, %c0_49] : memref<2x1x4x16x16xf32, #tpu.memory_space<vmem>>, vector<1x1x1x16x16xf32>
    %55 = vector.shape_cast %54 : vector<1x1x1x16x16xf32> to vector<16x16xf32>
    %56 = vector.shape_cast %51 : vector<16x16xf32> to vector<1x1x1x16x16xf32>
    tpu.vector_store %arg6[%c0_45, %c0_46, %c0_47, %c0_48, %c0_49], %56 {strides = array<i32>} : memref<2x1x4x16x16xf32, #tpu.memory_space<vmem>>, vector<1x1x1x16x16xf32>,
    %c1_50 = arith.constant 1 : index
    %c0_51 = arith.constant 0 : index
    %c0_52 = arith.constant 0 : index
    %c0_53 = arith.constant 0 : index
    %c0_54 = arith.constant 0 : index
    %57 = vector.load %arg6[%c1_50, %c0_51, %c0_52, %c0_53, %c0_54] : memref<2x1x4x16x16xf32, #tpu.memory_space<vmem>>, vector<1x1x1x16x16xf32>
    %58 = vector.shape_cast %57 : vector<1x1x1x16x16xf32> to vector<16x16xf32>
    %59 = vector.shape_cast %53 : vector<16x16xf32> to vector<1x1x1x16x16xf32>
    tpu.vector_store %arg6[%c1_50, %c0_51, %c0_52, %c0_53, %c0_54], %59 {strides = array<i32>} : memref<2x1x4x16x16xf32, #tpu.memory_space<vmem>>, vector<1x1x1x16x16xf32>,
    %60 = vector.extract_strided_slice %33 {offsets = [16, 0], sizes = [16, 16], strides = [1, 1]} : vector<64x16xf32> to vector<16x16xf32>
    %61 = vector.extract_strided_slice %35 {offsets = [16, 0], sizes = [16, 16], strides = [1, 1]} : vector<64x16xf32> to vector<16x16xf32>
    %cst_55 = arith.constant dense<0.000000e+00> : vector<16x16xf32>
    %62 = tpu.matmul %37, %60, %cst_55 {dimension_numbers = #tpu.dot_dimension_numbers<[1], [0], [0], [1], [0, 0, 1, 1], [], []>} : vector<16x16xf32>, vector<16x16xf32>, vector<16x16xf32> -> vector<16x16xf32>
    %cst_56 = arith.constant dense<0.000000e+00> : vector<16x16xf32>
    %63 = tpu.matmul %39, %61, %cst_56 {dimension_numbers = #tpu.dot_dimension_numbers<[1], [0], [0], [1], [0, 0, 1, 1], [], []>} : vector<16x16xf32>, vector<16x16xf32>, vector<16x16xf32> -> vector<16x16xf32>
    %64 = arith.addf %60, %61 : vector<16x16xf32>
    %cst_57 = arith.constant dense<0.000000e+00> : vector<16x16xf32>
    %65 = tpu.matmul %44, %64, %cst_57 {dimension_numbers = #tpu.dot_dimension_numbers<[1], [0], [0], [1], [0, 0, 1, 1], [], []>} : vector<16x16xf32>, vector<16x16xf32>, vector<16x16xf32> -> vector<16x16xf32>
    %66 = arith.subf %62, %63 : vector<16x16xf32>
    %67 = arith.subf %65, %62 : vector<16x16xf32>
    %68 = arith.subf %67, %63 : vector<16x16xf32>
    %c0_58 = arith.constant 0 : index
    %c0_59 = arith.constant 0 : index
    %c1_60 = arith.constant 1 : index
    %c0_61 = arith.constant 0 : index
    %c0_62 = arith.constant 0 : index
    %69 = vector.load %arg6[%c0_58, %c0_59, %c1_60, %c0_61, %c0_62] : memref<2x1x4x16x16xf32, #tpu.memory_space<vmem>>, vector<1x1x1x16x16xf32>
    %70 = vector.shape_cast %69 : vector<1x1x1x16x16xf32> to vector<16x16xf32>
    %71 = vector.shape_cast %66 : vector<16x16xf32> to vector<1x1x1x16x16xf32>
    tpu.vector_store %arg6[%c0_58, %c0_59, %c1_60, %c0_61, %c0_62], %71 {strides = array<i32>} : memref<2x1x4x16x16xf32, #tpu.memory_space<vmem>>, vector<1x1x1x16x16xf32>,
    %c1_63 = arith.constant 1 : index
    %c0_64 = arith.constant 0 : index
    %c1_65 = arith.constant 1 : index
    %c0_66 = arith.constant 0 : index
    %c0_67 = arith.constant 0 : index
    %72 = vector.load %arg6[%c1_63, %c0_64, %c1_65, %c0_66, %c0_67] : memref<2x1x4x16x16xf32, #tpu.memory_space<vmem>>, vector<1x1x1x16x16xf32>
    %73 = vector.shape_cast %72 : vector<1x1x1x16x16xf32> to vector<16x16xf32>
    %74 = vector.shape_cast %68 : vector<16x16xf32> to vector<1x1x1x16x16xf32>
    tpu.vector_store %arg6[%c1_63, %c0_64, %c1_65, %c0_66, %c0_67], %74 {strides = array<i32>} : memref<2x1x4x16x16xf32, #tpu.memory_space<vmem>>, vector<1x1x1x16x16xf32>,
    %75 = vector.extract_strided_slice %33 {offsets = [32, 0], sizes = [16, 16], strides = [1, 1]} : vector<64x16xf32> to vector<16x16xf32>
    %76 = vector.extract_strided_slice %35 {offsets = [32, 0], sizes = [16, 16], strides = [1, 1]} : vector<64x16xf32> to vector<16x16xf32>
    %cst_68 = arith.constant dense<0.000000e+00> : vector<16x16xf32>
    %77 = tpu.matmul %37, %75, %cst_68 {dimension_numbers = #tpu.dot_dimension_numbers<[1], [0], [0], [1], [0, 0, 1, 1], [], []>} : vector<16x16xf32>, vector<16x16xf32>, vector<16x16xf32> -> vector<16x16xf32>
    %cst_69 = arith.constant dense<0.000000e+00> : vector<16x16xf32>
    %78 = tpu.matmul %39, %76, %cst_69 {dimension_numbers = #tpu.dot_dimension_numbers<[1], [0], [0], [1], [0, 0, 1, 1], [], []>} : vector<16x16xf32>, vector<16x16xf32>, vector<16x16xf32> -> vector<16x16xf32>
    %79 = arith.addf %75, %76 : vector<16x16xf32>
    %cst_70 = arith.constant dense<0.000000e+00> : vector<16x16xf32>
    %80 = tpu.matmul %44, %79, %cst_70 {dimension_numbers = #tpu.dot_dimension_numbers<[1], [0], [0], [1], [0, 0, 1, 1], [], []>} : vector<16x16xf32>, vector<16x16xf32>, vector<16x16xf32> -> vector<16x16xf32>
    %81 = arith.subf %77, %78 : vector<16x16xf32>
    %82 = arith.subf %80, %77 : vector<16x16xf32>
    %83 = arith.subf %82, %78 : vector<16x16xf32>
    %c0_71 = arith.constant 0 : index
    %c0_72 = arith.constant 0 : index
    %c2 = arith.constant 2 : index
    %c0_73 = arith.constant 0 : index
    %c0_74 = arith.constant 0 : index
    %84 = vector.load %arg6[%c0_71, %c0_72, %c2, %c0_73, %c0_74] : memref<2x1x4x16x16xf32, #tpu.memory_space<vmem>>, vector<1x1x1x16x16xf32>
    %85 = vector.shape_cast %84 : vector<1x1x1x16x16xf32> to vector<16x16xf32>
    %86 = vector.shape_cast %81 : vector<16x16xf32> to vector<1x1x1x16x16xf32>
    tpu.vector_store %arg6[%c0_71, %c0_72, %c2, %c0_73, %c0_74], %86 {strides = array<i32>} : memref<2x1x4x16x16xf32, #tpu.memory_space<vmem>>, vector<1x1x1x16x16xf32>,
    %c1_75 = arith.constant 1 : index
    %c0_76 = arith.constant 0 : index
    %c2_77 = arith.constant 2 : index
    %c0_78 = arith.constant 0 : index
    %c0_79 = arith.constant 0 : index
    %87 = vector.load %arg6[%c1_75, %c0_76, %c2_77, %c0_78, %c0_79] : memref<2x1x4x16x16xf32, #tpu.memory_space<vmem>>, vector<1x1x1x16x16xf32>
    %88 = vector.shape_cast %87 : vector<1x1x1x16x16xf32> to vector<16x16xf32>
    %89 = vector.shape_cast %83 : vector<16x16xf32> to vector<1x1x1x16x16xf32>
    tpu.vector_store %arg6[%c1_75, %c0_76, %c2_77, %c0_78, %c0_79], %89 {strides = array<i32>} : memref<2x1x4x16x16xf32, #tpu.memory_space<vmem>>, vector<1x1x1x16x16xf32>,
    %90 = vector.extract_strided_slice %33 {offsets = [48, 0], sizes = [16, 16], strides = [1, 1]} : vector<64x16xf32> to vector<16x16xf32>
    %91 = vector.extract_strided_slice %35 {offsets = [48, 0], sizes = [16, 16], strides = [1, 1]} : vector<64x16xf32> to vector<16x16xf32>
    %cst_80 = arith.constant dense<0.000000e+00> : vector<16x16xf32>
    %92 = tpu.matmul %37, %90, %cst_80 {dimension_numbers = #tpu.dot_dimension_numbers<[1], [0], [0], [1], [0, 0, 1, 1], [], []>} : vector<16x16xf32>, vector<16x16xf32>, vector<16x16xf32> -> vector<16x16xf32>
    %cst_81 = arith.constant dense<0.000000e+00> : vector<16x16xf32>
    %93 = tpu.matmul %39, %91, %cst_81 {dimension_numbers = #tpu.dot_dimension_numbers<[1], [0], [0], [1], [0, 0, 1, 1], [], []>} : vector<16x16xf32>, vector<16x16xf32>, vector<16x16xf32> -> vector<16x16xf32>
    %94 = arith.addf %90, %91 : vector<16x16xf32>
    %cst_82 = arith.constant dense<0.000000e+00> : vector<16x16xf32>
    %95 = tpu.matmul %44, %94, %cst_82 {dimension_numbers = #tpu.dot_dimension_numbers<[1], [0], [0], [1], [0, 0, 1, 1], [], []>} : vector<16x16xf32>, vector<16x16xf32>, vector<16x16xf32> -> vector<16x16xf32>
    %96 = arith.subf %92, %93 : vector<16x16xf32>
    %97 = arith.subf %95, %92 : vector<16x16xf32>
    %98 = arith.subf %97, %93 : vector<16x16xf32>
    %c0_83 = arith.constant 0 : index
    %c0_84 = arith.constant 0 : index
    %c3 = arith.constant 3 : index
    %c0_85 = arith.constant 0 : index
    %c0_86 = arith.constant 0 : index
    %99 = vector.load %arg6[%c0_83, %c0_84, %c3, %c0_85, %c0_86] : memref<2x1x4x16x16xf32, #tpu.memory_space<vmem>>, vector<1x1x1x16x16xf32>
    %100 = vector.shape_cast %99 : vector<1x1x1x16x16xf32> to vector<16x16xf32>
    %101 = vector.shape_cast %96 : vector<16x16xf32> to vector<1x1x1x16x16xf32>
    tpu.vector_store %arg6[%c0_83, %c0_84, %c3, %c0_85, %c0_86], %101 {strides = array<i32>} : memref<2x1x4x16x16xf32, #tpu.memory_space<vmem>>, vector<1x1x1x16x16xf32>,
    %c1_87 = arith.constant 1 : index
    %c0_88 = arith.constant 0 : index
    %c3_89 = arith.constant 3 : index
    %c0_90 = arith.constant 0 : index
    %c0_91 = arith.constant 0 : index
    %102 = vector.load %arg6[%c1_87, %c0_88, %c3_89, %c0_90, %c0_91] : memref<2x1x4x16x16xf32, #tpu.memory_space<vmem>>, vector<1x1x1x16x16xf32>
    %103 = vector.shape_cast %102 : vector<1x1x1x16x16xf32> to vector<16x16xf32>
    %104 = vector.shape_cast %98 : vector<16x16xf32> to vector<1x1x1x16x16xf32>
    tpu.vector_store %arg6[%c1_87, %c0_88, %c3_89, %c0_90, %c0_91], %104 {strides = array<i32>} : memref<2x1x4x16x16xf32, #tpu.memory_space<vmem>>, vector<1x1x1x16x16xf32>,
    return
  }
  func.func @transform_0(%arg0: i32, %arg1: i32) -> (i32, i32, i32, i32) {
    %c0_i32 = arith.constant 0 : i32
    %c0_i32_0 = arith.constant 0 : i32
    %c0_i32_1 = arith.constant 0 : i32
    %c0_i32_2 = arith.constant 0 : i32
    return %c0_i32, %arg0, %c0_i32_0, %c0_i32_1 : i32, i32, i32, i32
  }
  func.func @transform_1(%arg0: i32, %arg1: i32) -> (i32, i32, i32, i32, i32) {
    %c0_i32 = arith.constant 0 : i32
    %c0_i32_0 = arith.constant 0 : i32
    %c0_i32_1 = arith.constant 0 : i32
    %c0_i32_2 = arith.constant 0 : i32
    return %c0_i32, %arg0, %arg1, %c0_i32_0, %c0_i32_1 : i32, i32, i32, i32, i32
  }
  func.func @transform_2(%arg0: i32, %arg1: i32) -> (i32, i32, i32, i32) {
    %c0_i32 = arith.constant 0 : i32
    %c0_i32_0 = arith.constant 0 : i32
    %c0_i32_1 = arith.constant 0 : i32
    %c0_i32_2 = arith.constant 0 : i32
    %c0_i32_3 = arith.constant 0 : i32
    return %c0_i32, %c0_i32_0, %c0_i32_1, %c0_i32_2 : i32, i32, i32, i32
  }
  func.func @transform_3(%arg0: i32, %arg1: i32) -> (i32, i32, i32, i32) {
    %c0_i32 = arith.constant 0 : i32
    %c0_i32_0 = arith.constant 0 : i32
    %c0_i32_1 = arith.constant 0 : i32
    %c0_i32_2 = arith.constant 0 : i32
    return %c0_i32, %arg0, %c0_i32_0, %c0_i32_1 : i32, i32, i32, i32
  }
  func.func @transform_4(%arg0: i32, %arg1: i32) -> (i32, i32, i32, i32, i32) {
    %c0_i32 = arith.constant 0 : i32
    %c0_i32_0 = arith.constant 0 : i32
    %c0_i32_1 = arith.constant 0 : i32
    %c0_i32_2 = arith.constant 0 : i32
    return %c0_i32, %arg0, %arg1, %c0_i32_0, %c0_i32_1 : i32, i32, i32, i32, i32
  }
}

</mosaic_0001>

<bundles_post_ra>
// kernel: tpu_custom_call.1
= control target key start
LH: loop header
LB: loop body
LE: loop exit
PB: predicated region body
PF: predicated region fallthrough
CT: control target
= control target key end

     0   :  { %s2047_s0 = inlined_call_operand.hbm [shape: f32[2,2,16,16], index: 0, kind: input, shape index: {}]   ;;  %s2048_s1 = inlined_call_operand.hbm [shape: f32[2,2,4,16,16], index: 1, kind: input, shape index: {}]   ;;  %s2049_s2 = inlined_call_operand.hbm [shape: f32[2,1,16,16], index: 2, kind: input, shape index: {}]   ;;  %s2050_s3 = inlined_call_operand.hbm [shape: f32[2,2,16,16], index: 3, kind: input, shape index: {}]   ;;  %s2051_s4 = inlined_call_operand.hbm [shape: f32[2,2,4,16,16], index: 4, kind: output, shape index: {}]  }
   0x1   :  { %2054 = sst [smem:[#allocation27_spill]] %s2047_s0 }
   0x2   :  { %2055 = sst [smem:[#allocation28_spill]] %s2048_s1 }
   0x3   :  { %2056 = sst [smem:[#allocation29_spill]] %s2049_s2 }
   0x4   :  { %9 = vsyncpa [#allocation3], 0 }
   0x5   :  { %11 = vsyncpa [#allocation3 + $0x1], 0 }
   0x6   :  { %12 = vsyncpa [#allocation6], 0 }
   0x7   :  { %14 = vsyncpa [#allocation6 + $0x1], 0 }
   0x8   :  { %15 = vsyncpa [#allocation9], 0 }
   0x9   :  { %17 = vsyncpa [#allocation9 + $0x1], 0 }
   0xa   :  { %18 = vsyncpa [#allocation4], 0 }
   0xb   :  { %20 = vsyncpa [#allocation4 + $0x1], 0  ;;  %s1641_s15 = smov 0   ;;  %s1643_s16 = smov 0  }
   0xc   :  { %s1645_s17 = smov 0   ;;  %s1647_s18 = smov 0  }
   0xd   :  { %s1649_s19 = smov 0   ;;  %s1651_s20 = smov 0  }
   0xe LB: > { %s1672_s21 = sadd.s32 4294967295, %s1588_s20   ;;  %s1260_s22 = sadd.s32 4294967294, %s1588_s20   ;;  %s1588_s20 = sphi %s1651_s20, %s26_s20   ;;  %s1584_s19 = sphi %s1649_s19, %s2071_s19   ;;  %s1580_s18 = sphi %s1647_s18, %s2070_s18   ;;  %s1576_s17 = sphi %s1645_s17, %s2069_s17   ;;  %s1572_s16 = sphi %s1643_s16, %s2068_s16   ;;  %s1568_s15 = sphi %s1641_s15, %s2067_s15  }
   0xf   : > { %s38_s23 = sadd.s32 1, %s1584_s19  ;;  %s45_s24 = sadd.s32 1, %s1576_s17 }
  0x10   : > { %p40_p0 = scmp.ge.s32.totalorder %s38_s23, 2  ;;  %p52_p1 = scmp.ne.s32.totalorder %s1576_s17, %s1572_s16 }
  0x11   : > { %p53_p2 = scmp.eq.s32.totalorder %s1588_s20, 0  ;;  %p58_p3 = scmp.ne.s32.totalorder %s1572_s16, %s1568_s15 }
  0x12   : > { %s2073_s23 = smov (%p40_p0, %s38_s23), 0  ;;  %p59_p5 = scmp.eq.s32.totalorder %s1672_s21, 0 }
  0x13   : > { %p1684_p4 = por %p53_p2, %p52_p1  ;;  %s42_s26 = ssub.s32 %s1584_s19, %s2073_s23 }
  0x14   : > { %p159_p6 = scmp.eq.s32.totalorder %s1672_s21, 1  ;;  %p43_p7 = scmp.eq.s32.totalorder %s42_s26, 0 }
  0x15   : > { %p1694_p8 = por %p59_p5, %p58_p3  ;;  %p165_p10 = scmp.eq.s32.totalorder %s1260_s22, 1 }
  0x16   : > { %p1698_p9 = por %p159_p6, %p52_p1  ;;  %p1261_p12 = scmp.ge.s32.totalorder %s1588_s20, 1 }
  0x17   : > { %s1703_s29 = scalar_select %p43_p7, %s1576_s17, %s45_s24  }
  0x18   : > { %p1705_p11 = por %p165_p10, %p58_p3  ;;  %p172_p13 = scmp.lt.s32.totalorder %s1588_s20, 3 }
  0x19   : > { %s2061_s2 = sld [smem:[#allocation29_spill]]  ;;  %s1590_s9 = smov [#allocation7]  }
  0x1a   : > { %p1714_p0 = pnand %p1261_p12, %p172_p13  ;;  %s185_s10 = sshll.u32 %s1590_s9, 4  ;;  %s186_s10 = int_to_ptr.vmem [resolvable:$true] %s185_s10 }
  0x1b   : > { %s1591_s11 = smov 128   ;;  %s1592_s12 = smov 8  }
  0x1c   : > { %p1407_p1 = pneg %p1714_p0  ;;  %p1263_p3 = scmp.ge.s32.totalorder %s1588_s20, 2 }
  0x1e   : > { %p1408_p2 = pnand %p1407_p1, %p59_p5  ;;  %195 = sbr.rel (%p1263_p3) target bundleno = 77 (0x4d), region = 20 }
  0x1f   : > { %s183_s7 = sshll.u32 %s2061_s2, 4  ;;  %s184_s7 = int_to_ptr.hbm [resolvable:$true] %s183_s7 }
  0x20   : > { %1410 = dma.hbm_to_vmem [thread:$0]  (!%p1408_p2), %s184_s7, 512, %s186_s10, [#allocation6], %s1591_s11, %s1591_s11, %s1592_s12  }
  0x23   : > { %s1726_s13 = sand.u32 1, %s1576_s17   ;;  %s2053_s14 = sshll.u32 %s1584_s19, 4 }
  0x24   : > { %s2052_s22 = sshll.u32 %s1726_s13, 5  ;;  %s2063_s0 = sld [smem:[#allocation27_spill]] }
  0x25   : > { %s1370_s6 = scalar_select %p1684_p4, [#allocation0], [#allocation19] }
  0x26   : > { %s203_s9 = scalar_lea.vmem [#allocation2], %s2052_s22  ;;  %s1593_s12 = smov 512  }
  0x27   : > { %s223_s10 = sshll.u32 %s203_s9, 4  ;;  %s213_s11 = sld [smem:[%s1370_s6]]   ;;  %s224_s10 = int_to_ptr.vmem [resolvable:$true] %s223_s10 }
  0x28   : > { %1371 = sst [smem:[#allocation12]] (%p1684_p4), %s1593_s12  ;;  %s1594_s2 = smov 256  }
  0x29   : > { %1372 = sst [smem:[#allocation12 + $0x1]] (%p1684_p4), %s1594_s2  ;;  %s1595_s24 = smov 2  }
  0x2a   : > { %s208_s5 = scalar_lea.hbm %s2063_s0, %s2053_s14  ;;  %1373 = sst [smem:[#allocation12 + $0x2]] (%p1684_p4), %s1595_s24 }
  0x2b   : > { %s221_s7 = sshll.u32 %s208_s5, 4  ;;  %s1596_s26 = smov 128   ;;  %s222_s7 = int_to_ptr.hbm [resolvable:$true] %s221_s7 }
  0x2c   : > { %1374 = sst [smem:[#allocation12 + $0x3]] (%p1684_p4), %s1596_s26  ;;  %s1597_s9 = smov 8  }
  0x2d   : > { %s1267_s5 = sshll.u32 %s213_s11, 26  ;;  %1375 = sst [smem:[#allocation12 + $0x4]] (%p1684_p4), %s1596_s26 }
  0x2e   : > { %s1268_s6 = sadd.s32 134217728, %s1267_s5  ;;  %1376 = sst [smem:[#allocation12 + $0x5]] (%p1684_p4), %s1597_s9 }
  0x2f   : > { %s200_s22 = scalar_lea.sflag [#allocation3], %s1726_s13  ;;  %s1598_s14 = smov [#allocation11]  }
  0x30   : > { %1377 = dma.general (%p1684_p4), %s222_s7, 512, %s224_s10, %s200_s22, %s1598_s14, [#allocation12], %s1268_s6, 0  }
  0x31   : > { %s246_s2 = sand.u32 1, %s1588_s20   ;;  %s1269_s12 = sshll.u32 %s1726_s13, 7 }
  0x32   : > { %s1365_s11 = sshll.u32 %s1584_s19, 6  ;;  %s250_s24 = scalar_lea.vmem [#allocation5], %s1269_s12 }
  0x33   : > { %s273_s26 = sshll.u32 %s250_s24, 4  ;;  %s2064_s1 = sld [smem:[#allocation28_spill]]  ;;  %s274_s26 = int_to_ptr.vmem [resolvable:$true] %s273_s26 }
  0x34   : > { %s1378_s14 = scalar_select %p1684_p4, [#allocation0], [#allocation20] }
  0x35   : > { %s1599_s10 = smov 2048   ;;  %s1600_s6 = smov 1024  }
  0x36   : > { %s263_s22 = sld [smem:[%s1378_s14]]   ;;  %s1601_s12 = smov 8  }
  0x37   : > { %1379 = sst [smem:[#allocation14]] (%p1684_p4), %s1599_s10  ;;  %s1602_s24 = smov 128  }
  0x38   : > { %1380 = sst [smem:[#allocation14 + $0x1]] (%p1684_p4), %s1600_s6  ;;  %s247_s5 = scalar_lea.sflag [#allocation6], %s246_s2 }
  0x39   : > { %s258_s0 = scalar_lea.hbm %s2064_s1, %s1365_s11  ;;  %1381 = sst [smem:[#allocation14 + $0x2]] (%p1684_p4), %s1601_s12 }
  0x3a   : > { %s271_s7 = sshll.u32 %s258_s0, 4  ;;  %1382 = sst [smem:[#allocation14 + $0x3]] (%p1684_p4), %s1602_s24  ;;  %s272_s7 = int_to_ptr.hbm [resolvable:$true] %s271_s7 }
  0x3b   : > { %1383 = sst [smem:[#allocation14 + $0x4]] (%p1684_p4), %s1602_s24  ;;  %s1603_s9 = smov [#allocation13]  }
  0x3c   : > { %s1272_s11 = sshll.u32 %s263_s22, 26  ;;  %1384 = sst [smem:[#allocation14 + $0x5]] (%p1684_p4), %s1601_s12 }
  0x3d   : > { %s1273_s0 = sadd.s32 134217728, %s1272_s11 }
  0x3e   : > { %1385 = dma.general (%p1684_p4), %s272_s7, 2048, %s274_s26, %s247_s5, %s1603_s9, [#allocation14], %s1273_s0, 0  }
  0x3f   : > { %s2065_s14 = sshll.u32 %s1584_s19, 4  ;;  %s2066_s22 = sshll.u32 %s1726_s13, 5 }
  0x40   : > { %s305_s24 = scalar_lea.hbm %s2050_s3, %s2065_s14  ;;  %s300_s1 = scalar_lea.vmem [#allocation8], %s2066_s22 }
  0x41   : > { %s320_s12 = sshll.u32 %s300_s1, 4  ;;  %s318_s11 = sshll.u32 %s305_s24, 4  ;;  %s321_s12 = int_to_ptr.vmem [resolvable:$true] %s320_s12  ;;  %s319_s11 = int_to_ptr.hbm [resolvable:$true] %s318_s11 }
  0x42   : > { %s1386_s2 = scalar_select %p1684_p4, [#allocation0], [#allocation21] }
  0x43   : > { %s1604_s7 = smov 512   ;;  %s1605_s0 = smov 256  }
  0x44   : > { %s310_s26 = sld [smem:[%s1386_s2]]   ;;  %s1606_s5 = smov 2  }
  0x45   : > { %1387 = sst [smem:[#allocation16]] (%p1684_p4), %s1604_s7  ;;  %s1607_s9 = smov 128  }
  0x46   : > { %1388 = sst [smem:[#allocation16 + $0x1]] (%p1684_p4), %s1605_s0  ;;  %s1608_s10 = smov 8  }
  0x47   : > { %1389 = sst [smem:[#allocation16 + $0x2]] (%p1684_p4), %s1606_s5  ;;  %s297_s6 = scalar_lea.sflag [#allocation9], %s1726_s13 }
  0x48   : > { %1390 = sst [smem:[#allocation16 + $0x3]] (%p1684_p4), %s1607_s9  ;;  %s1609_s24 = smov [#allocation15]  }
  0x49   : > { %1391 = sst [smem:[#allocation16 + $0x4]] (%p1684_p4), %s1607_s9 }
  0x4a   : > { %s1277_s1 = sshll.u32 %s310_s26, 26  ;;  %1392 = sst [smem:[#allocation16 + $0x5]] (%p1684_p4), %s1608_s10 }
  0x4b   : > { %s1278_s14 = sadd.s32 134217728, %s1277_s1 }
  0x4c   : > { %1393 = dma.general (%p1684_p4), %s319_s11, 512, %s321_s12, %s297_s6, %s1609_s24, [#allocation16], %s1278_s14, 0  }
  0x4d PF: > { %345 = sbr.rel (%p1714_p0) target bundleno = 474 (0x1da), region = 36  ;;  %s1803_s22 = sand.u32 (!%p1714_p0), 1, %s1572_s16  }
  0x4e   : > { %s1280_s2 = sshll.u32 (!%p1714_p0), %s1803_s22, 5  ;;  %s348_s26 = scalar_lea.sflag (!%p1714_p0), [#allocation3], %s1803_s22 }
  0x4f   : > { %s1807_s7 = scalar_lea.vmem (!%p1714_p0), [#allocation2], %s1280_s2 }
  0x52   : > { %1547 = dma.done.wait (%p1694_p8), %s348_s26, 512  }
  0x53   : > { %1549 = vsyncadd (%p1694_p8), %s348_s26, 4294966784  ;;  %s357_s25 = sand.u32 1, %s1672_s21   ;;  %s1281_s8 = sshll.u32 %s1803_s22, 7 }
  0x54   : > { %s358_s13 = scalar_lea.sflag [#allocation6], %s357_s25  ;;  %s1817_s12 = scalar_lea.vmem [#allocation5], %s1281_s8 }
  0x55   : > { %1551 = dma.done.wait (%p1694_p8), %s358_s13, 2048  }
  0x56   : > { %1553 = vsyncadd (%p1694_p8), %s358_s13, 4294965248 }
  0x57   : > { %1555 = dma.done.wait (%p59_p5), [#allocation6], 512  }
  0x58   : > { %1557 = vsyncadd (%p59_p5), [#allocation6], 4294966784  ;;  %s373_s11 = scalar_lea.sflag [#allocation9], %s1803_s22  ;;  %s376_s0 = scalar_lea.vmem [#allocation8], %s1280_s2 }
  0x59   : > { %1559 = dma.done.wait (%p1694_p8), %s373_s11, 512  }
  0x5a   : > { %1561 = vsyncadd (%p1694_p8), %s373_s11, 4294966784  ;;  %v485_v0 = vld [vmem:[%s376_s0 + $0x8] sm:$0xff]  ;;  %v1296_v1 = vld [vmem:[%s376_s0 + $0x18] sm:$0xff]  ;;  %vm489_vm0 = vcmask 130048   ;;  %s1970_s21 = scalar_lea.vmem [#allocation10], %s1281_s8  ;;  %s1076_s27 = scalar_lea.sflag [#allocation4], %s1803_s22 }
  0x5b   : > { %v484_v2 = vld [vmem:[%s376_s0] sm:$0xff]  ;;  %528 = vmatpush.msra.mxu0 %v485_v0  ;;  %593 = vmatpush.msra.mxu1 %v1296_v1  ;;  %v1295_v3 = vld [vmem:[%s376_s0 + $0x10] sm:$0xff]  ;;  %v629_v4 = vadd.f32 %v1296_v1, %v485_v0  ;;  %v1841_v10 = vld [vmem:[%s1807_s7 + $0x8] sm:$0xff] }
  0x5c   : > { %v1833_v5 = vld [vmem:[%s1807_s7] sm:$0xff]  ;;  %v1836_v6 = vld [vmem:[%s1807_s7 + $0x10] sm:$0xff]  ;;  %v628_v9 = vadd.f32 %v1295_v3, %v484_v2  ;;  %v1847_v14 = vld [vmem:[%s1807_s7 + $0x18] sm:$0xff] }
  0x5d   : > { %v419_v7 = vld [vmem:[%s1817_s12] sm:$0xff]  ;;  %529 = vmatpush.msra.mxu0 %v484_v2  ;;  %594 = vmatpush.msra.mxu1 %v1295_v3  ;;  %v420_v15 = vld [vmem:[%s1817_s12 + $0x8] sm:$0xff]  ;;  %v421_v27 = vld [vmem:[%s1817_s12 + $0x10] sm:$0xff] }
  0x5e   : > { %v1287_v8 = vld [vmem:[%s1817_s12 + $0x40] sm:$0xff]  ;;  %v436_v11 = vmul.f32 %v419_v7, %v1833_v5  ;;  %v1288_v16 = vld [vmem:[%s1817_s12 + $0x48] sm:$0xff]  ;;  %668 = vmatpush.msra.mxu2 %v629_v4  ;;  %v468_v17 = vmul.f32 %v1836_v6, %v419_v7  ;;  %v437_v19 = vmul.f32 %v420_v15, %v1841_v10  ;;  %v469_v23 = vmul.f32 %v1847_v14, %v420_v15  ;;  %v1289_v28 = vld [vmem:[%s1817_s12 + $0x50] sm:$0xff] }
  0x5f   : > { %v444_v12 = vmul.f32 %v1287_v8, %v1836_v6  ;;  %v460_v13 = vmul.f32 %v1287_v8, %v1833_v5  ;;  %v445_v21 = vmul.f32 %v1288_v16, %v1847_v14  ;;  %v461_v22 = vmul.f32 %v1288_v16, %v1841_v10  ;;  %v422_v36 = vld [vmem:[%s1817_s12 + $0x18] sm:$0xff]  ;;  %v423_v45 = vld [vmem:[%s1817_s12 + $0x20] sm:$0xff]  ;;  %v424_v54 = vld [vmem:[%s1817_s12 + $0x28] sm:$0xff] }
  0x60   : > { %669 = vmatpush.msra.mxu2 %v628_v9  ;;  %v438_v29 = vmul.f32 %v421_v27, %v1833_v5  ;;  %v446_v31 = vmul.f32 %v1289_v28, %v1836_v6  ;;  %v462_v32 = vmul.f32 %v1289_v28, %v1833_v5  ;;  %v470_v33 = vmul.f32 %v1836_v6, %v421_v27  ;;  %v1290_v37 = vld [vmem:[%s1817_s12 + $0x58] sm:$0xff]  ;;  %v1291_v46 = vld [vmem:[%s1817_s12 + $0x60] sm:$0xff]  ;;  %v1292_v55 = vld [vmem:[%s1817_s12 + $0x68] sm:$0xff] }
  0x61   : > { %v452_v18 = vsub.f32 %v436_v11, %v444_v12  ;;  %v476_v20 = vadd.f32 %v468_v17, %v460_v13  ;;  %v453_v25 = vsub.f32 %v437_v19, %v445_v21  ;;  %v477_v26 = vadd.f32 %v469_v23, %v461_v22  ;;  %v425_v63 = vld [vmem:[%s1817_s12 + $0x30] sm:$0xff]  ;;  %v426_v11 = vld [vmem:[%s1817_s12 + $0x38] sm:$0xff] }
  0x62   : > { %v454_v34 = vsub.f32 %v438_v29, %v446_v31  ;;  %v478_v35 = vadd.f32 %v470_v33, %v462_v32  ;;  %v439_v38 = vmul.f32 %v422_v36, %v1841_v10  ;;  %v447_v40 = vmul.f32 %v1290_v37, %v1847_v14  ;;  %v1293_v0 = vld [vmem:[%s1817_s12 + $0x70] sm:$0xff]  ;;  %v1294_v12 = vld [vmem:[%s1817_s12 + $0x78] sm:$0xff]  ;;  %v1920_v32 = vld [vmem:[#allocation7 + $0x8] sm:$0xff] }
  0x63   : > { %1297 = vmatmul.msk.f32.vlgmr.msra.gmra.mxu0 %vm489_vm0, %v452_v18  ;;  %1305 = vmatmul.msk.f32.vlgmr.msra.gmra.mxu1 %vm489_vm0, %v476_v20  ;;  %v620_v24 = vadd.f32 %v476_v20, %v452_v18  ;;  %v621_v30 = vadd.f32 %v477_v26, %v453_v25  ;;  %v463_v41 = vmul.f32 %v1290_v37, %v1841_v10 }
  0x64   : > { %v622_v39 = vadd.f32 %v478_v35, %v454_v34  ;;  %v471_v42 = vmul.f32 %v1847_v14, %v422_v36  ;;  %v455_v43 = vsub.f32 %v439_v38, %v447_v40  ;;  %v440_v47 = vmul.f32 %v423_v45, %v1833_v5  ;;  %v1924_v40 = vld [vmem:[#allocation7 + $0x10] sm:$0xff] }
  0x65   : > { %1313 = vmatmul.msk.f32.vlgmr.msra.gmra.mxu2 %vm489_vm0, %v620_v24  ;;  %v448_v49 = vmul.f32 %v1291_v46, %v1836_v6  ;;  %v464_v50 = vmul.f32 %v1291_v46, %v1833_v5  ;;  %v472_v51 = vmul.f32 %v1836_v6, %v423_v45  ;;  %v441_v56 = vmul.f32 %v424_v54, %v1841_v10 }
  0x66   : > { %v479_v44 = vadd.f32 %v471_v42, %v463_v41  ;;  %v449_v58 = vmul.f32 %v1292_v55, %v1847_v14  ;;  %v465_v59 = vmul.f32 %v1292_v55, %v1841_v10  ;;  %v473_v60 = vmul.f32 %v1847_v14, %v424_v54 }
  0x67   : > { %v456_v52 = vsub.f32 %v440_v47, %v448_v49  ;;  %v480_v53 = vadd.f32 %v472_v51, %v464_v50  ;;  %v442_v1 = vmul.f32 %v425_v63, %v1833_v5  ;;  %v450_v2 = vmul.f32 %v1293_v0, %v1836_v6  ;;  %v1928_v49 = vld [vmem:[#allocation7 + $0x18] sm:$0xff] }
  0x68   : > { %v623_v48 = vadd.f32 %v479_v44, %v455_v43  ;;  %v457_v61 = vsub.f32 %v441_v56, %v449_v58  ;;  %v481_v62 = vadd.f32 %v473_v60, %v465_v59  ;;  %v466_v3 = vmul.f32 %v1293_v0, %v1833_v5 }
  0x69   : > { %v624_v57 = vadd.f32 %v480_v53, %v456_v52  ;;  %v474_v4 = vmul.f32 %v1836_v6, %v425_v63  ;;  %v458_v8 = vsub.f32 %v442_v1, %v450_v2  ;;  %v443_v15 = vmul.f32 %v426_v11, %v1841_v10 }
  0x6a   : > { %v625_v7 = vadd.f32 %v481_v62, %v457_v61  ;;  %v451_v16 = vmul.f32 %v1294_v12, %v1847_v14  ;;  %v467_v5 = vmul.f32 %v1294_v12, %v1841_v10  ;;  %v475_v6 = vmul.f32 %v1847_v14, %v426_v11 }
  0x6b   : > { %1298 = vmatmul.msk.f32.gmra.mxu0 %vm489_vm0, %v453_v25  ;;  %1306 = vmatmul.msk.f32.gmra.mxu1 %vm489_vm0, %v477_v26  ;;  %v482_v9 = vadd.f32 %v474_v4, %v466_v3  ;;  %v1916_v25 = vld [vmem:[#allocation7] sm:$0xff] }
  0x6c   : > { %v459_v17 = vsub.f32 %v443_v15, %v451_v16  ;;  %v483_v18 = vadd.f32 %v475_v6, %v467_v5  ;;  %v724_v55 = vadd.f32 %v1924_v40, %v1916_v25 }
  0x6d   : > { %1314 = vmatmul.msk.f32.gmra.mxu2 %vm489_vm0, %v621_v30  ;;  %v626_v13 = vadd.f32 %v482_v9, %v458_v8 }
  0x6e   : > { %v627_v19 = vadd.f32 %v483_v18, %v459_v17 }
  0x73   : > { %1299 = vmatmul.msk.f32.gmra.mxu0 %vm489_vm0, %v454_v34  ;;  %1307 = vmatmul.msk.f32.gmra.mxu1 %vm489_vm0, %v478_v35 }
  0x75   : > { %1315 = vmatmul.msk.f32.gmra.mxu2 %vm489_vm0, %v622_v39 }
  0x7b   : > { %1300 = vmatmul.msk.f32.gmra.mxu0 %vm489_vm0, %v455_v43  ;;  %1308 = vmatmul.msk.f32.gmra.mxu1 %vm489_vm0, %v479_v44 }
  0x7d   : > { %1316 = vmatmul.msk.f32.gmra.mxu2 %vm489_vm0, %v623_v48 }
  0x83   : > { %1301 = vmatmul.msk.f32.gmra.mxu0 %vm489_vm0, %v456_v52  ;;  %1309 = vmatmul.msk.f32.gmra.mxu1 %vm489_vm0, %v480_v53 }
  0x85   : > { %1317 = vmatmul.msk.f32.gmra.mxu2 %vm489_vm0, %v624_v57 }
  0x8b   : > { %1302 = vmatmul.msk.f32.gmra.mxu0 %vm489_vm0, %v457_v61  ;;  %1310 = vmatmul.msk.f32.gmra.mxu1 %vm489_vm0, %v481_v62  ;;  %v725_v61 = vadd.f32 %v1928_v49, %v1920_v32 }
  0x8d   : > { %1318 = vmatmul.msk.f32.gmra.mxu2 %vm489_vm0, %v625_v7 }
  0x93   : > { %1303 = vmatmul.msk.f32.gmra.mxu0 %vm489_vm0, %v458_v8  ;;  %1311 = vmatmul.msk.f32.gmra.mxu1 %vm489_vm0, %v482_v9 }
  0x95   : > { %1319 = vmatmul.msk.f32.gmra.mxu2 %vm489_vm0, %v626_v13 }
  0x9b   : > { %1304 = vmatmul.msk.f32.gmra.mxu0 %vm489_vm0, %v459_v17  ;;  %1312 = vmatmul.msk.f32.gmra.mxu1 %vm489_vm0, %v483_v18 }
  0x9d   : > { %1320 = vmatmul.msk.f32.gmra.mxu2 %vm489_vm0, %v627_v19 }
  0xe0   : > { %v531_v20 = vpop.f32.mrf.mxu0  ;;  %v596_v21 = vpop.f32.mrf.mxu1 }
  0xe1   : > { %v695_v24 = vsub.f32 %v531_v20, %v596_v21 }
  0xe8   : > { %v534_v10 = vpop.f32.mrf.mxu0  ;;  %v599_v22 = vpop.f32.mrf.mxu1 }
  0xe9   : > { %v671_v14 = vpop.f32.mrf.mxu2  ;;  %v696_v23 = vsub.f32 %v534_v10, %v599_v22 }
  0xea   : > { %v703_v27 = vsub.f32 %v671_v14, %v531_v20 }
  0xeb   : > { %746 = vmatpush.msra.mxu3 %v696_v23 }
  0xec   : > { %v711_v33 = vsub.f32 %v703_v27, %v596_v21 }
  0xed   : > { %747 = vmatpush.msra.mxu3 %v695_v24 }
  0xee   : > { %1321 = vmatmul.msk.f32.vlgmr.msra.gmra.mxu3 %vm489_vm0, %v1916_v25  ;;  %v784_v36 = vadd.f32 %v711_v33, %v695_v24 }
  0xf0   : > { %v537_v26 = vpop.f32.mrf.mxu0  ;;  %v602_v28 = vpop.f32.mrf.mxu1 }
  0xf1   : > { %v674_v29 = vpop.f32.mrf.mxu2  ;;  %v697_v41 = vsub.f32 %v537_v26, %v602_v28 }
  0xf2   : > { %v704_v30 = vsub.f32 %v674_v29, %v534_v10 }
  0xf4   : > { %v712_v31 = vsub.f32 %v704_v30, %v599_v22 }
  0xf6   : > { %775 = vmatpush.msrb.mxu3 %v712_v31  ;;  %v785_v34 = vadd.f32 %v712_v31, %v696_v23 }
  0xf7   : > { %1322 = vmatmul.msk.f32.gmra.mxu3 %vm489_vm0, %v1920_v32 }
  0xf8   : > { %776 = vmatpush.msrb.mxu3 %v711_v33  ;;  %v540_v35 = vpop.f32.mrf.mxu0  ;;  %v605_v37 = vpop.f32.mrf.mxu1 }
  0xf9   : > { %v677_v38 = vpop.f32.mrf.mxu2  ;;  %v698_v39 = vsub.f32 %v540_v35, %v605_v37 }
  0xfa   : > { %806 = vmatpush.msra.mxu3 %v785_v34  ;;  %v705_v42 = vsub.f32 %v677_v38, %v537_v26 }
  0xfc   : > { %807 = vmatpush.msra.mxu3 %v784_v36  ;;  %v713_v47 = vsub.f32 %v705_v42, %v602_v28 }
  0xfe   : > { %v872_v51 = vadd.f32 %v713_v47, %v697_v41 }
  0xff   : > { %1323 = vmatmul.msk.f32.vlgmr.msrb.gmra.mxu3 %vm489_vm0, %v1924_v40 }
 0x100   : > { %840 = vmatpush.msrb.mxu3 %v698_v39  ;;  %v543_v43 = vpop.f32.mrf.mxu0  ;;  %v608_v44 = vpop.f32.mrf.mxu1 }
 0x101   : > { %v680_v45 = vpop.f32.mrf.mxu2  ;;  %v699_v57 = vsub.f32 %v543_v43, %v608_v44 }
 0x102   : > { %v706_v46 = vsub.f32 %v680_v45, %v540_v35  ;;  %841 = vmatpush.msrb.mxu3 %v697_v41 }
 0x104   : > { %v714_v48 = vsub.f32 %v706_v46, %v605_v37 }
 0x106   : > { %863 = vmatpush.msrb.mxu0 %v714_v48  ;;  %v873_v50 = vadd.f32 %v714_v48, %v698_v39 }
 0x107   : > { %1324 = vmatmul.msk.f32.gmra.mxu3 %vm489_vm0, %v1928_v49 }
 0x108   : > { %864 = vmatpush.msrb.mxu0 %v713_v47  ;;  %888 = vmatpush.msrb.mxu1 %v873_v50  ;;  %v546_v52 = vpop.f32.mrf.mxu0  ;;  %v611_v53 = vpop.f32.mrf.mxu1 }
 0x109   : > { %v683_v54 = vpop.f32.mrf.mxu2  ;;  %1331 = vmatmul.msk.f32.vlgmr.msrb.gmra.mxu0 %vm489_vm0, %v1924_v40  ;;  %v700_v56 = vsub.f32 %v546_v52, %v611_v53 }
 0x10a   : > { %889 = vmatpush.msrb.mxu1 %v872_v51  ;;  %v707_v58 = vsub.f32 %v683_v54, %v543_v43 }
 0x10b   : > { %1333 = vmatmul.msk.f32.vlgmr.msrb.gmra.mxu1 %vm489_vm0, %v724_v55  ;;  %923 = vmatpush.msrb.mxu2 %v700_v56 }
 0x10c   : > { %v715_v63 = vsub.f32 %v707_v58, %v608_v44 }
 0x10d   : > { %924 = vmatpush.msrb.mxu2 %v699_v57 }
 0x10e   : > { %1339 = vmatmul.msk.f32.vlgmr.msrb.gmra.mxu2 %vm489_vm0, %v1916_v25  ;;  %v955_v2 = vadd.f32 %v715_v63, %v699_v57 }
 0x10f   : > { %1325 = vmatmul.msk.f32.vlgmr.msra.gmra.mxu3 %vm489_vm0, %v724_v55 }
 0x110   : > { %v549_v59 = vpop.f32.mrf.mxu0  ;;  %v614_v62 = vpop.f32.mrf.mxu1 }
 0x111   : > { %v686_v60 = vpop.f32.mrf.mxu2  ;;  %1332 = vmatmul.msk.f32.gmra.mxu0 %vm489_vm0, %v1928_v49  ;;  %v701_v9 = vsub.f32 %v549_v59, %v614_v62 }
 0x112   : > { %v708_v0 = vsub.f32 %v686_v60, %v546_v52 }
 0x113   : > { %1334 = vmatmul.msk.f32.gmra.mxu1 %vm489_vm0, %v725_v61 }
 0x114   : > { %v716_v1 = vsub.f32 %v708_v0, %v611_v53 }
 0x116   : > { %v956_v3 = vadd.f32 %v716_v1, %v700_v56  ;;  %946 = vmatpush.msra.mxu3 %v716_v1  ;;  %1340 = vmatmul.msk.f32.gmra.mxu2 %vm489_vm0, %v1920_v32 }
 0x117   : > { %1326 = vmatmul.msk.f32.gmra.mxu3 %vm489_vm0, %v725_v61 }
 0x118   : > { %947 = vmatpush.msra.mxu3 %v715_v63  ;;  %971 = vmatpush.msra.mxu0 %v956_v3  ;;  %v552_v4 = vpop.f32.mrf.mxu0  ;;  %v617_v8 = vpop.f32.mrf.mxu1 }
 0x119   : > { %v689_v7 = vpop.f32.mrf.mxu2  ;;  %v702_v11 = vsub.f32 %v552_v4, %v617_v8 }
 0x11a   : > { %972 = vmatpush.msra.mxu0 %v955_v2  ;;  %v709_v12 = vsub.f32 %v689_v7, %v549_v59 }
 0x11b   : > { %1343 = vmatmul.msk.f32.vlgmr.msra.gmra.mxu0 %vm489_vm0, %v724_v55  ;;  %1006 = vmatpush.msra.mxu1 %v702_v11 }
 0x11c   : > { %v717_v15 = vsub.f32 %v709_v12, %v614_v62 }
 0x11d   : > { %1007 = vmatpush.msra.mxu1 %v701_v9 }
 0x11e   : > { %1349 = vmatmul.msk.f32.vlgmr.msra.gmra.mxu1 %vm489_vm0, %v1916_v25  ;;  %v1038_v6 = vadd.f32 %v717_v15, %v701_v9 }
 0x11f   : > { %1329 = vmatmul.msk.f32.vlgmr.msrb.gmra.mxu3 %vm489_vm0, %v1916_v25 }
 0x121   : > { %v692_v13 = vpop.f32.mrf.mxu2 }
 0x122   : > { %v710_v16 = vsub.f32 %v692_v13, %v552_v4 }
 0x123   : > { %1344 = vmatmul.msk.f32.gmra.mxu0 %vm489_vm0, %v725_v61 }
 0x124   : > { %v718_v5 = vsub.f32 %v710_v16, %v617_v8 }
 0x126   : > { %v1039_v17 = vadd.f32 %v718_v5, %v702_v11  ;;  %1029 = vmatpush.msra.mxu2 %v718_v5  ;;  %1350 = vmatmul.msk.f32.gmra.mxu1 %vm489_vm0, %v1920_v32 }
 0x127   : > { %1330 = vmatmul.msk.f32.gmra.mxu3 %vm489_vm0, %v1920_v32 }
 0x128   : > { %1054 = vmatpush.msrb.mxu3 %v1039_v17  ;;  %1030 = vmatpush.msra.mxu2 %v717_v15 }
 0x129   : > { %1351 = vmatmul.msk.f32.vlgmr.msra.gmra.mxu2 %vm489_vm0, %v1924_v40 }
 0x12a   : > { %1055 = vmatpush.msrb.mxu3 %v1038_v6 }
 0x12f   : > { %1341 = vmatmul.msk.f32.vlgmr.msra.gmra.mxu3 %vm489_vm0, %v1924_v40 }
 0x131   : > { %1352 = vmatmul.msk.f32.gmra.mxu2 %vm489_vm0, %v1928_v49 }
 0x137   : > { %1342 = vmatmul.msk.f32.gmra.mxu3 %vm489_vm0, %v1928_v49 }
 0x13f   : > { %1353 = vmatmul.msk.f32.vlgmr.msrb.gmra.mxu3 %vm489_vm0, %v724_v55 }
 0x147   : > { %1354 = vmatmul.msk.f32.gmra.mxu3 %vm489_vm0, %v725_v61 }
 0x171   : > { %v749_v18 = vpop.f32.mrf.mxu3 }
 0x17a   : > { %v752_v19 = vpop.f32.mrf.mxu3 }
 0x182   : > { %v778_v20 = vpop.f32.mrf.mxu3 }
 0x183   : > { %v815_v21 = vsub.f32 %v749_v18, %v778_v20 }
 0x185   : > { %821 = vst.msk [vmem:[%s1970_s21] sm:$0xff] %vm489_vm0, %v815_v21 }
 0x186   : > { %v866_v25 = vpop.f32.mrf.mxu0 }
 0x188   : > { %v891_v26 = vpop.f32.mrf.mxu1 }
 0x18a   : > { %v781_v10 = vpop.f32.mrf.mxu3 }
 0x18b   : > { %v816_v22 = vsub.f32 %v752_v19, %v781_v10 }
 0x18d   : > { %822 = vst.msk [vmem:[%s1970_s21 + $0x8] sm:$0xff] %vm489_vm0, %v816_v22 }
 0x18e   : > { %v869_v31 = vpop.f32.mrf.mxu0 }
 0x190   : > { %v894_v32 = vpop.f32.mrf.mxu1 }
 0x191   : > { %v926_v28 = vpop.f32.mrf.mxu2 }
 0x192   : > { %v809_v14 = vpop.f32.mrf.mxu3 }
 0x193   : > { %v817_v23 = vsub.f32 %v809_v14, %v749_v18 }
 0x195   : > { %v819_v24 = vsub.f32 %v817_v23, %v778_v20 }
 0x197   : > { %1327 = vst.msk [vmem:[%s1970_s21 + $0x40] sm:$0xff] %vm489_vm0, %v819_v24 }
 0x198   : > { %v974_v40 = vpop.f32.mrf.mxu0 }
 0x199   : > { %v929_v36 = vpop.f32.mrf.mxu2  ;;  %v982_v46 = vsub.f32 %v974_v40, %v926_v28 }
 0x19a   : > { %v812_v27 = vpop.f32.mrf.mxu3 }
 0x19b   : > { %v818_v29 = vsub.f32 %v812_v27, %v752_v19  ;;  %v1009_v38 = vpop.f32.mrf.mxu1 }
 0x19d   : > { %v820_v30 = vsub.f32 %v818_v29, %v781_v10 }
 0x19f   : > { %1328 = vst.msk [vmem:[%s1970_s21 + $0x48] sm:$0xff] %vm489_vm0, %v820_v30 }
 0x1a0   : > { %v977_v51 = vpop.f32.mrf.mxu0 }
 0x1a1   : > { %v983_v54 = vsub.f32 %v977_v51, %v929_v36 }
 0x1a2   : > { %v843_v33 = vpop.f32.mrf.mxu3 }
 0x1a3   : > { %v897_v34 = vsub.f32 %v843_v33, %v866_v25  ;;  %v899_v35 = vsub.f32 %v891_v26, %v843_v33  ;;  %v1012_v48 = vpop.f32.mrf.mxu1 }
 0x1a5   : > { %1335 = vst.msk [vmem:[%s1970_s21 + $0x10] sm:$0xff] %vm489_vm0, %v897_v34  ;;  %v901_v37 = vsub.f32 %v899_v35, %v866_v25 }
 0x1a7   : > { %1337 = vst.msk [vmem:[%s1970_s21 + $0x50] sm:$0xff] %vm489_vm0, %v901_v37 }
 0x1aa   : > { %v846_v39 = vpop.f32.mrf.mxu3 }
 0x1ab   : > { %v898_v41 = vsub.f32 %v846_v39, %v869_v31  ;;  %v900_v42 = vsub.f32 %v894_v32, %v846_v39 }
 0x1ac   : > { %v1032_v43 = vpop.f32.mrf.mxu2 }
 0x1ad   : > { %1336 = vst.msk [vmem:[%s1970_s21 + $0x18] sm:$0xff] %vm489_vm0, %v898_v41  ;;  %v902_v44 = vsub.f32 %v900_v42, %v869_v31  ;;  %v1063_v45 = vsub.f32 %v1009_v38, %v1032_v43 }
 0x1af   : > { %1338 = vst.msk [vmem:[%s1970_s21 + $0x58] sm:$0xff] %vm489_vm0, %v902_v44 }
 0x1b0   : > { %1355 = vst.msk [vmem:[%s1970_s21 + $0x30] sm:$0xff] %vm489_vm0, %v1063_v45 }
 0x1b2   : > { %v949_v47 = vpop.f32.mrf.mxu3 }
 0x1b3   : > { %v980_v49 = vsub.f32 %v926_v28, %v949_v47  ;;  %v984_v50 = vsub.f32 %v982_v46, %v949_v47 }
 0x1b4   : > { %v1035_v52 = vpop.f32.mrf.mxu2 }
 0x1b5   : > { %1345 = vst.msk [vmem:[%s1970_s21 + $0x20] sm:$0xff] %vm489_vm0, %v980_v49  ;;  %v1064_v53 = vsub.f32 %v1012_v48, %v1035_v52 }
 0x1b6   : > { %1347 = vst.msk [vmem:[%s1970_s21 + $0x60] sm:$0xff] %vm489_vm0, %v984_v50 }
 0x1b7   : > { %1356 = vst.msk [vmem:[%s1970_s21 + $0x38] sm:$0xff] %vm489_vm0, %v1064_v53 }
 0x1ba   : > { %v952_v55 = vpop.f32.mrf.mxu3 }
 0x1bb   : > { %v981_v56 = vsub.f32 %v929_v36, %v952_v55  ;;  %v985_v57 = vsub.f32 %v983_v54, %v952_v55 }
 0x1bd   : > { %1346 = vst.msk [vmem:[%s1970_s21 + $0x28] sm:$0xff] %vm489_vm0, %v981_v56 }
 0x1be   : > { %1348 = vst.msk [vmem:[%s1970_s21 + $0x68] sm:$0xff] %vm489_vm0, %v985_v57 }
 0x1c2   : > { %v1057_v58 = vpop.f32.mrf.mxu3 }
 0x1c3   : > { %v1065_v59 = vsub.f32 %v1057_v58, %v1009_v38 }
 0x1c5   : > { %v1067_v60 = vsub.f32 %v1065_v59, %v1032_v43 }
 0x1c7   : > { %1357 = vst.msk [vmem:[%s1970_s21 + $0x70] sm:$0xff] %vm489_vm0, %v1067_v60 }
 0x1ca   : > { %v1060_v61 = vpop.f32.mrf.mxu3 }
 0x1cb   : > { %v1066_v62 = vsub.f32 %v1060_v61, %v1012_v48 }
 0x1cd   : > { %v1068_v63 = vsub.f32 %v1066_v62, %v1035_v52 }
 0x1cf   : > { %1358 = vst.msk [vmem:[%s1970_s21 + $0x78] sm:$0xff] %vm489_vm0, %v1068_v63 }
 0x1d0   : > { %s1367_s5 = sshll.u32 %s1580_s18, 6  ;;  %s1101_s9 = sshll.u32 %s1970_s21, 4  ;;  %s1102_s9 = int_to_ptr.vmem [resolvable:$true] %s1101_s9 }
 0x1d1   : > { %s1090_s10 = scalar_lea.hbm %s2051_s4, %s1367_s5  ;;  %s1610_s24 = smov 1024  }
 0x1d2   : > { %s1103_s6 = sshll.u32 %s1090_s10, 4  ;;  %1399 = sst [smem:[#allocation18]] (%p1698_p9), %s1610_s24  ;;  %s1104_s6 = int_to_ptr.hbm [resolvable:$true] %s1103_s6 }
 0x1d3   : > { %s1611_s22 = smov 2048   ;;  %s1612_s2 = smov 8  }
 0x1d4   : > { %1400 = sst [smem:[#allocation18 + $0x1]] (%p1698_p9), %s1611_s22  ;;  %s1613_s26 = smov 128  }
 0x1d5   : > { %1401 = sst [smem:[#allocation18 + $0x2]] (%p1698_p9), %s1612_s2  ;;  %s1614_s18 = smov [#allocation17]  }
 0x1d6   : > { %1402 = sst [smem:[#allocation18 + $0x3]] (%p1698_p9), %s1613_s26  ;;  %s1615_s7 = smov 0  }
 0x1d7   : > { %1403 = sst [smem:[#allocation18 + $0x4]] (%p1698_p9), %s1613_s26 }
 0x1d8   : > { %1404 = sst [smem:[#allocation18 + $0x5]] (%p1698_p9), %s1612_s2 }
 0x1d9   : > { %1405 = dma.general (%p1698_p9), %s1102_s9, 2048, %s1104_s6, %s1076_s27, %s1614_s18, [#allocation18], %s1615_s7, 0  }
 0x1da PF: > { %s1131_s25 = sand.u32 1, %s1568_s15   ;;  %p1412_p4 = pnand %p1263_p3, %p1705_p11 }
 0x1db   : > { %s1132_s8 = scalar_lea.sflag [#allocation4], %s1131_s25 }
 0x1dc   : > { %p1413_p5 = pneg %p1412_p4 }
 0x1de   : > { %1563 = dma.done.wait (%p1413_p5), %s1132_s8, 2048  }
 0x1df   : > { %1565 = vsyncadd (%p1413_p5), %s1132_s8, 4294965248  ;;  %s26_s20 = sadd.s32 1, %s1588_s20   ;;  %s2067_s15 = smov %s1572_s16 }
 0x1e0   : > { %p23_p6 = scmp.ge.s32.totalorder %s26_s20, 4   ;;  %s2068_s16 = smov %s1576_s17 }
 0x1e1   : > { %s2069_s17 = smov %s1703_s29  ;;  %s2070_s18 = smov %s1584_s19 }
 0x1e2   : > { %s2071_s19 = smov %s2073_s23  ;;  %25 = sbr.rel (!%p23_p6) target bundleno = 14 (0xe), region = 142 }
 0x1e7   :  { %1138 = vsyncpa [#allocation3], 1 }
 0x1e8   :  { %1140 = vsyncpa [#allocation3 + $0x1], 1 }
 0x1e9   :  { %1141 = vsyncpa [#allocation6], 1 }
 0x1ea   :  { %1143 = vsyncpa [#allocation6 + $0x1], 1 }
 0x1eb   :  { %1144 = vsyncpa [#allocation9], 1 }
 0x1ec   :  { %1146 = vsyncpa [#allocation9 + $0x1], 1 }
 0x1ed   :  { %1147 = vsyncpa [#allocation4], 1 }
 0x1ee   :  { %1149 = vsyncpa [#allocation4 + $0x1], 1 }

</bundles_post_ra>
